<compile_context>
chip_gen: v7x
topology: tpu7x:2x2x1
jax: 0.10.0
libtpu: 0.0.40
codegen_flags: <defaults>
</compile_context>

<pallas_src>
import functools

import jax
import jax.numpy as jnp
from jax import lax
from jax.experimental import pallas as pl
from jax.experimental.pallas import tpu as pltpu


def _round_up(x, m):
    return ((x + m - 1) // m) * m


def _tpu_tuning():
    """(row_tile_cap, vmem_limit_bytes) per TPU generation; safe defaults otherwise."""
    try:
        kind = jax.devices()[0].device_kind.lower()
    except Exception:
        kind = ""
    if "v7" in kind:                                    # 64 MiB VMEM per TensorCore
        return 512, 48 << 20
    if "v6" in kind or "trillium" in kind:              # 128 MiB VMEM, mem-bound sweet spot at 512 rows
        return 512, 96 << 20
    if "v5 lite" in kind or "v5lite" in kind or "v5e" in kind:
        return 256, 64 << 20                            # 16 MiB scoped default too small at C>=768
    return 256, None                                    # unknown chip: conservative, no explicit limit


# ----------------------------- Pallas kernels ------------------------------ #

def _ln1_kv_ln2_kernel(x_ref, g1_ref, b1_ref, g2_ref, b2_ref, gamma1_ref,
                       wk_ref, bk_ref, wv_ref, bv_ref,
                       k_ref, v_ref, out_ref):
    # x:(TM,C) f32.  Outputs: k,v staging (TM,C) bf16 and the final non-cls block output
    # out = 2 * LN2(x + gamma1 * LN1(x))  (cls rows of `out` are garbage, patched later).
    x = x_ref[...]
    mu = jnp.mean(x, axis=-1, keepdims=True)
    var = jnp.mean(jnp.square(x - mu), axis=-1, keepdims=True)
    y1 = (x - mu) * lax.rsqrt(var + 1e-5) * g1_ref[...] + b1_ref[...]
    y1b = y1.astype(jnp.bfloat16)
    k_ref[...] = (jnp.dot(y1b, wk_ref[...], preferred_element_type=jnp.float32)
                  + bk_ref[...]).astype(jnp.bfloat16)
    v_ref[...] = (jnp.dot(y1b, wv_ref[...], preferred_element_type=jnp.float32)
                  + bv_ref[...]).astype(jnp.bfloat16)
    r = x + gamma1_ref[...] * y1
    mu2 = jnp.mean(r, axis=-1, keepdims=True)
    var2 = jnp.mean(jnp.square(r - mu2), axis=-1, keepdims=True)
    out_ref[...] = 2.0 * ((r - mu2) * lax.rsqrt(var2 + 1e-5) * g2_ref[...] + b2_ref[...])


def _cls_q_kernel(x_ref, g1_ref, b1_ref, wq_ref, bq_ref, q_ref, *, scale):
    # cls rows only: LayerNorm1 + batched Q projection; attention scale folded in.
    x = x_ref[...]
    mu = jnp.mean(x, axis=-1, keepdims=True)
    var = jnp.mean(jnp.square(x - mu), axis=-1, keepdims=True)
    y = (x - mu) * lax.rsqrt(var + 1e-5) * g1_ref[...] + b1_ref[...]
    q_ref[...] = (jnp.dot(y.astype(jnp.bfloat16), wq_ref[...],
                          preferred_element_type=jnp.float32) + bq_ref[...]) * scale


def _cls_attn_kernel(q_ref, k_ref, v_ref, seg_ref, o_ref):
    # Per-batch program, all heads at once.  q:(1,C) f32 (pre-scaled), k/v:(N,C) bf16,
    # seg:(C,h) one-hot head-segment matrix.  Emits raw attention output (1,C).
    q = q_ref[...]
    k = k_ref[...].astype(jnp.float32)
    v = v_ref[...].astype(jnp.float32)
    prod = k * q                                                     # (N, C)  VPU
    logits = jnp.dot(prod, seg_ref[...],
                     preferred_element_type=jnp.float32)             # (N, h)  per-head sum
    m = jnp.max(logits, axis=0, keepdims=True)
    e = jnp.exp(logits - m)
    p = e / jnp.sum(e, axis=0, keepdims=True)                        # softmax over N
    p_full = lax.dot_general(p, seg_ref[...], (((1,), (1,)), ((), ())),
                             preferred_element_type=jnp.float32)     # (N, C) broadcast heads
    o_ref[...] = jnp.sum(p_full * v, axis=0, keepdims=True)          # (1, C)  attn @ v


def _cls_proj_ln2_fc1_kernel(attn_ref, xcls_ref, pw_ref, pb_ref, gamma1_ref,
                             g2_ref, b2_ref, w1_ref, b1_ref, y_ref, h_ref):
    # cls rows, batched over B: proj matmul + gamma1 residual + LayerNorm2 + MLP fc1.
    proj = jnp.dot(attn_ref[...].astype(jnp.bfloat16), pw_ref[...],
                   preferred_element_type=jnp.float32) + pb_ref[...]
    cls1 = xcls_ref[...] + gamma1_ref[...] * proj
    mu = jnp.mean(cls1, axis=-1, keepdims=True)
    var = jnp.mean(jnp.square(cls1 - mu), axis=-1, keepdims=True)
    y = (cls1 - mu) * lax.rsqrt(var + 1e-5) * g2_ref[...] + b2_ref[...]
    y_ref[...] = y
    h_ref[...] = jnp.dot(y.astype(jnp.bfloat16), w1_ref[...],
                         preferred_element_type=jnp.float32) + b1_ref[...]


def _cls_fc2_kernel(h_ref, w2_ref, b2_ref, gamma2_ref, y_ref, o_ref):
    # cls rows: MLP fc2 + gamma2 + residual add -> final row-0 output.
    m = jnp.dot(h_ref[...].astype(jnp.bfloat16), w2_ref[...],
                preferred_element_type=jnp.float32) + b2_ref[...]
    o_ref[...] = y_ref[...] + gamma2_ref[...] * m


# ------------------------------ forward pass ------------------------------- #

@functools.partial(jax.jit, static_argnames=("heads",))
def class_attention_block_forward(params, x, *, heads):
    B, N, C = x.shape
    dh = C // heads
    scale = dh ** -0.5
    M = B * N
    f32 = jnp.float32
    bf16 = jnp.bfloat16

    tm_cap, vmem_limit = _tpu_tuning()
    TM = min(tm_cap, _round_up(M, 8))
    gm = pl.cdiv(M, TM)
    cp_kwargs = dict(dimension_semantics=("parallel",))
    if vmem_limit is not None:
        cp_kwargs["vmem_limit_bytes"] = vmem_limit
    par_row = pltpu.CompilerParams(**cp_kwargs)

    # Parameter staging: bf16 weights for the MXU, f32 vectors for VPU epilogues.
    g1 = params['ln1_g'].reshape(1, C).astype(f32)
    b1 = params['ln1_b'].reshape(1, C).astype(f32)
    g2 = params['ln2_g'].reshape(1, C).astype(f32)
    b2 = params['ln2_b'].reshape(1, C).astype(f32)
    gamma1 = params['gamma1'].reshape(1, C).astype(f32)
    gamma2 = params['gamma2'].reshape(1, C).astype(f32)
    wqkv = params['qkv_w']                              # (C, 3C) = [Wq | Wk | Wv]
    bqkv = params['qkv_b']                              # (3C,)
    wq = wqkv[:, 0:C].astype(bf16)
    wk = wqkv[:, C:2 * C].astype(bf16)
    wv = wqkv[:, 2 * C:3 * C].astype(bf16)
    bq = bqkv[0:C].reshape(1, C).astype(f32)
    bk = bqkv[C:2 * C].reshape(1, C).astype(f32)
    bv = bqkv[2 * C:3 * C].reshape(1, C).astype(f32)
    wproj = params['proj_w'].astype(bf16)               # (C, C)
    bproj = params['proj_b'].reshape(1, C).astype(f32)
    H = params['fc1_w'].shape[1]
    w1 = params['fc1_w'].astype(bf16)                   # (C, H)
    bm1 = params['fc1_b'].reshape(1, H).astype(f32)
    w2 = params['fc2_w'].astype(bf16)                   # (H, C)
    bm2 = params['fc2_b'].reshape(1, C).astype(f32)

    xf = x.astype(f32)
    x_flat = xf.reshape(M, C)
    x_cls = xf[:, 0, :]                                 # (B, C)

    row_spec = pl.BlockSpec((TM, C), lambda i: (i, 0))
    vec_c = pl.BlockSpec((1, C), lambda i: (0, 0))
    w_cc = pl.BlockSpec((C, C), lambda i: (0, 0))

    # 1) LN1 + K/V projection (bf16 staging) + fused LN2 "2*norm2" epilogue.
    #    `out_main` is already the final block output for every non-cls row.
    k_flat, v_flat, out_main = pl.pallas_call(
        _ln1_kv_ln2_kernel,
        out_shape=(jax.ShapeDtypeStruct((M, C), bf16),
                   jax.ShapeDtypeStruct((M, C), bf16),
                   jax.ShapeDtypeStruct((M, C), f32)),
        grid=(gm,),
        in_specs=[row_spec, vec_c, vec_c, vec_c, vec_c, vec_c,
                  w_cc, vec_c, w_cc, vec_c],
        out_specs=(row_spec, row_spec, row_spec),
        compiler_params=par_row,
    )(x_flat, g1, b1, g2, b2, gamma1, wk, bk, wv, bv)

    # 2) q for the B cls rows only (one batched matmul; scale folded in).
    q_cls = pl.pallas_call(
        functools.partial(_cls_q_kernel, scale=scale),
        out_shape=jax.ShapeDtypeStruct((B, C), f32),
    )(x_cls, g1, b1, wq, bq)

    # One-hot head-segment matrix: seg[c, h] = 1 iff channel c belongs to head h.
    seg = (jnp.arange(C, dtype=jnp.int32)[:, None] // dh
           == jnp.arange(heads, dtype=jnp.int32)[None, :]).astype(f32)

    # 3) Class attention: one program per batch element, all heads batched, K/V read
    #    as separate lane-aligned bf16 tensors (no unused Q third, no in-kernel slices).
    attn_cls = pl.pallas_call(
        _cls_attn_kernel,
        out_shape=jax.ShapeDtypeStruct((B, 1, C), f32),
        grid=(B,),
        in_specs=[pl.BlockSpec((None, 1, C), lambda b: (b, 0, 0)),
                  pl.BlockSpec((None, N, C), lambda b: (b, 0, 0)),
                  pl.BlockSpec((None, N, C), lambda b: (b, 0, 0)),
                  pl.BlockSpec((C, heads), lambda b: (0, 0))],
        out_specs=pl.BlockSpec((None, 1, C), lambda b: (b, 0, 0)),
        compiler_params=pltpu.CompilerParams(dimension_semantics=("parallel",)),
    )(q_cls.reshape(B, 1, C), k_flat.reshape(B, N, C), v_flat.reshape(B, N, C), seg)

    # 4) cls branch, batched over B: proj + gamma1 residual + LayerNorm2 + fc1.
    y_cls, h_pre = pl.pallas_call(
        _cls_proj_ln2_fc1_kernel,
        out_shape=(jax.ShapeDtypeStruct((B, C), f32),
                   jax.ShapeDtypeStruct((B, H), f32)),
    )(attn_cls.reshape(B, C), x_cls, wproj, bproj, gamma1, g2, b2, w1, bm1)

    # TODO(synk): exact erf-GELU kept in XLA (only B rows) — Mosaic erf lowering is not
    # guaranteed and the tanh approximation would change the module's nn.GELU() semantics.
    h_act = jax.nn.gelu(h_pre, approximate=False)

    # 5) fc2 + gamma2 + residual (cls rows).
    cls_out = pl.pallas_call(
        _cls_fc2_kernel,
        out_shape=jax.ShapeDtypeStruct((B, C), f32),
    )(h_act, w2, bm2, gamma2, y_cls)

    # Patch the B cls rows into the full output (in-place dynamic_update_slice instead
    # of a full-tensor concatenate copy).
    out = out_main.reshape(B, N, C)
    out = lax.dynamic_update_slice(out, cls_out[:, None, :], (0, 0, 0))
    return out


# ---------------------- pure-JAX reference (f32, exact) -------------------- #

def reference_forward(params, x, heads):
    B, N, C = x.shape
    dh = C // heads
    scale = dh ** -0.5

    def ln(v, g, b):
        mu = jnp.mean(v, axis=-1, keepdims=True)
        var = jnp.mean(jnp.square(v - mu), axis=-1, keepdims=True)
        return (v - mu) / jnp.sqrt(var + 1e-5) * g + b

    x1 = ln(x, params['ln1_g'], params['ln1_b'])
    qkv = x1 @ params['qkv_w'] + params['qkv_b']
    qkv = jnp.transpose(qkv.reshape(B, N, 3, heads, dh), (2, 0, 3, 1, 4))
    q, k, v = qkv[0], qkv[1], qkv[2]
    qc = q[:, :, 0:1]                                     # (B, h, 1, dh)
    attn = jnp.sum(qc * k, axis=-1) * scale               # (B, h, N)
    attn = jax.nn.softmax(attn, axis=-1)
    cls = jnp.matmul(attn[:, :, None, :], v)              # (B, h, 1, dh)
    cls = jnp.transpose(cls, (0, 2, 1, 3)).reshape(B, 1, C)
    cls = cls @ params['proj_w'] + params['proj_b']
    attn_out = jnp.concatenate([cls, x1[:, 1:]], axis=1)
    x = x + params['gamma1'] * attn_out
    x = ln(x, params['ln2_g'], params['ln2_b'])
    x_res = x
    h = x[:, :1] @ params['fc1_w'] + params['fc1_b']
    h = jax.nn.gelu(h, approximate=False)
    cls2 = params['gamma2'] * (h @ params['fc2_w'] + params['fc2_b'])
    x = jnp.concatenate([cls2, x[:, 1:]], axis=1)
    return x + x_res


# ------------------------------ param init --------------------------------- #

def init_params(key, *, dim, mlp_ratio=4, eta=1e-5):
    ks = jax.random.split(key, 10)
    hdim = int(dim * mlp_ratio)
    f32 = jnp.float32

    def w(k, shape, std=0.02):
        return std * jax.random.normal(k, shape, f32)

    return dict(
        ln1_g=1.0 + 0.1 * jax.random.normal(ks[0], (dim,), f32),
        ln1_b=0.1 * jax.random.normal(ks[1], (dim,), f32),
        ln2_g=1.0 + 0.1 * jax.random.normal(ks[2], (dim,), f32),
        ln2_b=0.1 * jax.random.normal(ks[3], (dim,), f32),
        qkv_w=w(ks[4], (dim, 3 * dim)), qkv_b=0.02 * jax.random.normal(ks[5], (3 * dim,), f32),
        proj_w=w(ks[6], (dim, dim)), proj_b=jnp.zeros((dim,), f32),
        fc1_w=w(ks[7], (dim, hdim)), fc1_b=0.02 * jax.random.normal(ks[8], (hdim,), f32),
        fc2_w=w(ks[9], (hdim, dim)), fc2_b=jnp.zeros((dim,), f32),
        gamma1=eta * jnp.ones((dim,), f32),
        gamma2=eta * jnp.ones((dim,), f32),
    )


if __name__ == "__main__":
    key = jax.random.PRNGKey(0)
    pkey, xkey = jax.random.split(key)
    B, N, C, heads = 2, 8, 32, 4
    # eta larger than the 1e-5 default so the attention / MLP residual branches are
    # actually exercised by the numeric check (parameter value, not a semantic change).
    params = init_params(pkey, dim=C, eta=0.1)
    x = jax.random.normal(xkey, (B, N, C), dtype=jnp.float32)

    out = class_attention_block_forward(params, x, heads=heads)
    jax.block_until_ready(out)

    ref = reference_forward(params, x, heads)
    assert out.shape == (B, N, C) and out.dtype == jnp.float32
    err = float(jnp.max(jnp.abs(out - ref)))
    assert err < 1e-2, f"max abs error vs f32 reference: {err}"
    print("KERNEL_OK")
</pallas_src>

<mosaic_0001>
module attributes {stable_mosaic.version = 11 : i64} {
  func.func @_ln1_kv_ln2_kernel(%arg0: i32, %arg1: memref<16x32xf32, #tpu.memory_space<vmem>>, %arg2: memref<1x32xf32, #tpu.memory_space<vmem>>, %arg3: memref<1x32xf32, #tpu.memory_space<vmem>>, %arg4: memref<1x32xf32, #tpu.memory_space<vmem>>, %arg5: memref<1x32xf32, #tpu.memory_space<vmem>>, %arg6: memref<1x32xf32, #tpu.memory_space<vmem>>, %arg7: memref<32x32xbf16, #tpu.memory_space<vmem>>, %arg8: memref<1x32xf32, #tpu.memory_space<vmem>>, %arg9: memref<32x32xbf16, #tpu.memory_space<vmem>>, %arg10: memref<1x32xf32, #tpu.memory_space<vmem>>, %arg11: memref<16x32xbf16, #tpu.memory_space<vmem>>, %arg12: memref<16x32xbf16, #tpu.memory_space<vmem>>, %arg13: memref<16x32xf32, #tpu.memory_space<vmem>>) attributes {dimension_semantics = [#tpu.dimension_semantics<parallel>], iteration_bounds = array<i64: 1>, scalar_prefetch = 0 : i64, scratch_operands = 0 : i64, tpu.core_type = #tpu.core_type<tc>, window_params = [{transform_indices = @transform_0, window_bounds = array<i64: 16, 32>}, {pipeline_mode = #tpu.pipeline_mode<synchronous>, transform_indices = @transform_1, window_bounds = array<i64: 1, 32>}, {pipeline_mode = #tpu.pipeline_mode<synchronous>, transform_indices = @transform_2, window_bounds = array<i64: 1, 32>}, {pipeline_mode = #tpu.pipeline_mode<synchronous>, transform_indices = @transform_3, window_bounds = array<i64: 1, 32>}, {pipeline_mode = #tpu.pipeline_mode<synchronous>, transform_indices = @transform_4, window_bounds = array<i64: 1, 32>}, {pipeline_mode = #tpu.pipeline_mode<synchronous>, transform_indices = @transform_5, window_bounds = array<i64: 1, 32>}, {pipeline_mode = #tpu.pipeline_mode<synchronous>, transform_indices = @transform_6, window_bounds = array<i64: 32, 32>}, {pipeline_mode = #tpu.pipeline_mode<synchronous>, transform_indices = @transform_7, window_bounds = array<i64: 1, 32>}, {pipeline_mode = #tpu.pipeline_mode<synchronous>, transform_indices = @transform_8, window_bounds = array<i64: 32, 32>}, {pipeline_mode = #tpu.pipeline_mode<synchronous>, transform_indices = @transform_9, window_bounds = array<i64: 1, 32>}, {transform_indices = @transform_10, window_bounds = array<i64: 16, 32>}, {transform_indices = @transform_11, window_bounds = array<i64: 16, 32>}, {transform_indices = @transform_12, window_bounds = array<i64: 16, 32>}]} {
    %c0 = arith.constant 0 : index
    %c0_0 = arith.constant 0 : index
    %0 = vector.load %arg1[%c0, %c0_0] : memref<16x32xf32, #tpu.memory_space<vmem>>, vector<16x32xf32>
    %cst = arith.constant dense<0.000000e+00> : vector<16xf32>
    %1 = vector.multi_reduction <add>, %0, %cst [1] : vector<16x32xf32> to vector<16xf32>
    %2 = vector.shape_cast %1 : vector<16xf32> to vector<16x1xf32>
    %cst_1 = arith.constant 3.200000e+01 : f32
    %3 = vector.broadcast %cst_1 : f32 to vector<16x1xf32>
    %4 = arith.divf %2, %3 : vector<16x1xf32>
    %5 = vector.broadcast %4 : vector<16x1xf32> to vector<16x32xf32>
    %6 = arith.subf %0, %5 : vector<16x32xf32>
    %7 = arith.mulf %6, %6 : vector<16x32xf32>
    %cst_2 = arith.constant dense<0.000000e+00> : vector<16xf32>
    %8 = vector.multi_reduction <add>, %7, %cst_2 [1] : vector<16x32xf32> to vector<16xf32>
    %9 = vector.shape_cast %8 : vector<16xf32> to vector<16x1xf32>
    %cst_3 = arith.constant 3.200000e+01 : f32
    %10 = vector.broadcast %cst_3 : f32 to vector<16x1xf32>
    %11 = arith.divf %9, %10 : vector<16x1xf32>
    %12 = vector.broadcast %4 : vector<16x1xf32> to vector<16x32xf32>
    %13 = arith.subf %0, %12 : vector<16x32xf32>
    %cst_4 = arith.constant 9.99999974E-6 : f32
    %14 = vector.broadcast %cst_4 : f32 to vector<16x1xf32>
    %15 = arith.addf %11, %14 : vector<16x1xf32>
    %16 = math.rsqrt %15 : vector<16x1xf32>
    %17 = vector.broadcast %16 : vector<16x1xf32> to vector<16x32xf32>
    %18 = arith.mulf %13, %17 : vector<16x32xf32>
    %c0_5 = arith.constant 0 : index
    %c0_6 = arith.constant 0 : index
    %19 = vector.load %arg2[%c0_5, %c0_6] : memref<1x32xf32, #tpu.memory_space<vmem>>, vector<1x32xf32>
    %20 = vector.broadcast %19 : vector<1x32xf32> to vector<16x32xf32>
    %21 = arith.mulf %18, %20 : vector<16x32xf32>
    %c0_7 = arith.constant 0 : index
    %c0_8 = arith.constant 0 : index
    %22 = vector.load %arg3[%c0_7, %c0_8] : memref<1x32xf32, #tpu.memory_space<vmem>>, vector<1x32xf32>
    %23 = vector.broadcast %22 : vector<1x32xf32> to vector<16x32xf32>
    %24 = arith.addf %21, %23 : vector<16x32xf32>
    %25 = arith.truncf %24 : vector<16x32xf32> to vector<16x32xbf16>
    %c0_9 = arith.constant 0 : index
    %c0_10 = arith.constant 0 : index
    %26 = vector.load %arg7[%c0_9, %c0_10] : memref<32x32xbf16, #tpu.memory_space<vmem>>, vector<32x32xbf16>
    %cst_11 = arith.constant dense<0.000000e+00> : vector<16x32xf32>
    %27 = tpu.matmul %25, %26, %cst_11 {dimension_numbers = #tpu.dot_dimension_numbers<[1], [0], [0], [1], [0, 0, 1, 1], [], []>} : vector<16x32xbf16>, vector<32x32xbf16>, vector<16x32xf32> -> vector<16x32xf32>
    %c0_12 = arith.constant 0 : index
    %c0_13 = arith.constant 0 : index
    %28 = vector.load %arg8[%c0_12, %c0_13] : memref<1x32xf32, #tpu.memory_space<vmem>>, vector<1x32xf32>
    %29 = vector.broadcast %28 : vector<1x32xf32> to vector<16x32xf32>
    %30 = arith.addf %27, %29 : vector<16x32xf32>
    %31 = arith.truncf %30 : vector<16x32xf32> to vector<16x32xbf16>
    %c0_14 = arith.constant 0 : index
    %c0_15 = arith.constant 0 : index
    %32 = vector.load %arg11[%c0_14, %c0_15] : memref<16x32xbf16, #tpu.memory_space<vmem>>, vector<16x32xbf16>
    tpu.vector_store %arg11[%c0_14, %c0_15], %31 {strides = array<i32>} : memref<16x32xbf16, #tpu.memory_space<vmem>>, vector<16x32xbf16>,
    %c0_16 = arith.constant 0 : index
    %c0_17 = arith.constant 0 : index
    %33 = vector.load %arg9[%c0_16, %c0_17] : memref<32x32xbf16, #tpu.memory_space<vmem>>, vector<32x32xbf16>
    %cst_18 = arith.constant dense<0.000000e+00> : vector<16x32xf32>
    %34 = tpu.matmul %25, %33, %cst_18 {dimension_numbers = #tpu.dot_dimension_numbers<[1], [0], [0], [1], [0, 0, 1, 1], [], []>} : vector<16x32xbf16>, vector<32x32xbf16>, vector<16x32xf32> -> vector<16x32xf32>
    %c0_19 = arith.constant 0 : index
    %c0_20 = arith.constant 0 : index
    %35 = vector.load %arg10[%c0_19, %c0_20] : memref<1x32xf32, #tpu.memory_space<vmem>>, vector<1x32xf32>
    %36 = vector.broadcast %35 : vector<1x32xf32> to vector<16x32xf32>
    %37 = arith.addf %34, %36 : vector<16x32xf32>
    %38 = arith.truncf %37 : vector<16x32xf32> to vector<16x32xbf16>
    %c0_21 = arith.constant 0 : index
    %c0_22 = arith.constant 0 : index
    %39 = vector.load %arg12[%c0_21, %c0_22] : memref<16x32xbf16, #tpu.memory_space<vmem>>, vector<16x32xbf16>
    tpu.vector_store %arg12[%c0_21, %c0_22], %38 {strides = array<i32>} : memref<16x32xbf16, #tpu.memory_space<vmem>>, vector<16x32xbf16>,
    %c0_23 = arith.constant 0 : index
    %c0_24 = arith.constant 0 : index
    %40 = vector.load %arg6[%c0_23, %c0_24] : memref<1x32xf32, #tpu.memory_space<vmem>>, vector<1x32xf32>
    %41 = vector.broadcast %40 : vector<1x32xf32> to vector<16x32xf32>
    %42 = arith.mulf %41, %24 : vector<16x32xf32>
    %43 = arith.addf %0, %42 : vector<16x32xf32>
    %cst_25 = arith.constant dense<0.000000e+00> : vector<16xf32>
    %44 = vector.multi_reduction <add>, %43, %cst_25 [1] : vector<16x32xf32> to vector<16xf32>
    %45 = vector.shape_cast %44 : vector<16xf32> to vector<16x1xf32>
    %cst_26 = arith.constant 3.200000e+01 : f32
    %46 = vector.broadcast %cst_26 : f32 to vector<16x1xf32>
    %47 = arith.divf %45, %46 : vector<16x1xf32>
    %48 = vector.broadcast %47 : vector<16x1xf32> to vector<16x32xf32>
    %49 = arith.subf %43, %48 : vector<16x32xf32>
    %50 = arith.mulf %49, %49 : vector<16x32xf32>
    %cst_27 = arith.constant dense<0.000000e+00> : vector<16xf32>
    %51 = vector.multi_reduction <add>, %50, %cst_27 [1] : vector<16x32xf32> to vector<16xf32>
    %52 = vector.shape_cast %51 : vector<16xf32> to vector<16x1xf32>
    %cst_28 = arith.constant 3.200000e+01 : f32
    %53 = vector.broadcast %cst_28 : f32 to vector<16x1xf32>
    %54 = arith.divf %52, %53 : vector<16x1xf32>
    %55 = vector.broadcast %47 : vector<16x1xf32> to vector<16x32xf32>
    %56 = arith.subf %43, %55 : vector<16x32xf32>
    %cst_29 = arith.constant 9.99999974E-6 : f32
    %57 = vector.broadcast %cst_29 : f32 to vector<16x1xf32>
    %58 = arith.addf %54, %57 : vector<16x1xf32>
    %59 = math.rsqrt %58 : vector<16x1xf32>
    %60 = vector.broadcast %59 : vector<16x1xf32> to vector<16x32xf32>
    %61 = arith.mulf %56, %60 : vector<16x32xf32>
    %c0_30 = arith.constant 0 : index
    %c0_31 = arith.constant 0 : index
    %62 = vector.load %arg4[%c0_30, %c0_31] : memref<1x32xf32, #tpu.memory_space<vmem>>, vector<1x32xf32>
    %63 = vector.broadcast %62 : vector<1x32xf32> to vector<16x32xf32>
    %64 = arith.mulf %61, %63 : vector<16x32xf32>
    %c0_32 = arith.constant 0 : index
    %c0_33 = arith.constant 0 : index
    %65 = vector.load %arg5[%c0_32, %c0_33] : memref<1x32xf32, #tpu.memory_space<vmem>>, vector<1x32xf32>
    %66 = vector.broadcast %65 : vector<1x32xf32> to vector<16x32xf32>
    %67 = arith.addf %64, %66 : vector<16x32xf32>
    %cst_34 = arith.constant 2.000000e+00 : f32
    %68 = vector.broadcast %cst_34 : f32 to vector<16x32xf32>
    %69 = arith.mulf %68, %67 : vector<16x32xf32>
    %c0_35 = arith.constant 0 : index
    %c0_36 = arith.constant 0 : index
    %70 = vector.load %arg13[%c0_35, %c0_36] : memref<16x32xf32, #tpu.memory_space<vmem>>, vector<16x32xf32>
    tpu.vector_store %arg13[%c0_35, %c0_36], %69 {strides = array<i32>} : memref<16x32xf32, #tpu.memory_space<vmem>>, vector<16x32xf32>,
    return
  }
  func.func @transform_0(%arg0: i32) -> (i32, i32) {
    %c0_i32 = arith.constant 0 : i32
    %c0_i32_0 = arith.constant 0 : i32
    return %arg0, %c0_i32 : i32, i32
  }
  func.func @transform_1(%arg0: i32) -> (i32, i32) {
    %c0_i32 = arith.constant 0 : i32
    %c0_i32_0 = arith.constant 0 : i32
    %c0_i32_1 = arith.constant 0 : i32
    return %c0_i32, %c0_i32_0 : i32, i32
  }
  func.func @transform_2(%arg0: i32) -> (i32, i32) {
    %c0_i32 = arith.constant 0 : i32
    %c0_i32_0 = arith.constant 0 : i32
    %c0_i32_1 = arith.constant 0 : i32
    return %c0_i32, %c0_i32_0 : i32, i32
  }
  func.func @transform_3(%arg0: i32) -> (i32, i32) {
    %c0_i32 = arith.constant 0 : i32
    %c0_i32_0 = arith.constant 0 : i32
    %c0_i32_1 = arith.constant 0 : i32
    return %c0_i32, %c0_i32_0 : i32, i32
  }
  func.func @transform_4(%arg0: i32) -> (i32, i32) {
    %c0_i32 = arith.constant 0 : i32
    %c0_i32_0 = arith.constant 0 : i32
    %c0_i32_1 = arith.constant 0 : i32
    return %c0_i32, %c0_i32_0 : i32, i32
  }
  func.func @transform_5(%arg0: i32) -> (i32, i32) {
    %c0_i32 = arith.constant 0 : i32
    %c0_i32_0 = arith.constant 0 : i32
    %c0_i32_1 = arith.constant 0 : i32
    return %c0_i32, %c0_i32_0 : i32, i32
  }
  func.func @transform_6(%arg0: i32) -> (i32, i32) {
    %c0_i32 = arith.constant 0 : i32
    %c0_i32_0 = arith.constant 0 : i32
    %c0_i32_1 = arith.constant 0 : i32
    return %c0_i32, %c0_i32_0 : i32, i32
  }
  func.func @transform_7(%arg0: i32) -> (i32, i32) {
    %c0_i32 = arith.constant 0 : i32
    %c0_i32_0 = arith.constant 0 : i32
    %c0_i32_1 = arith.constant 0 : i32
    return %c0_i32, %c0_i32_0 : i32, i32
  }
  func.func @transform_8(%arg0: i32) -> (i32, i32) {
    %c0_i32 = arith.constant 0 : i32
    %c0_i32_0 = arith.constant 0 : i32
    %c0_i32_1 = arith.constant 0 : i32
    return %c0_i32, %c0_i32_0 : i32, i32
  }
  func.func @transform_9(%arg0: i32) -> (i32, i32) {
    %c0_i32 = arith.constant 0 : i32
    %c0_i32_0 = arith.constant 0 : i32
    %c0_i32_1 = arith.constant 0 : i32
    return %c0_i32, %c0_i32_0 : i32, i32
  }
  func.func @transform_10(%arg0: i32) -> (i32, i32) {
    %c0_i32 = arith.constant 0 : i32
    %c0_i32_0 = arith.constant 0 : i32
    return %arg0, %c0_i32 : i32, i32
  }
  func.func @transform_11(%arg0: i32) -> (i32, i32) {
    %c0_i32 = arith.constant 0 : i32
    %c0_i32_0 = arith.constant 0 : i32
    return %arg0, %c0_i32 : i32, i32
  }
  func.func @transform_12(%arg0: i32) -> (i32, i32) {
    %c0_i32 = arith.constant 0 : i32
    %c0_i32_0 = arith.constant 0 : i32
    return %arg0, %c0_i32 : i32, i32
  }
}

module attributes {stable_mosaic.version = 11 : i64} {
  func.func @_cls_q_kernel(%arg0: memref<2x32xf32, #tpu.memory_space<vmem>>, %arg1: memref<1x32xf32, #tpu.memory_space<vmem>>, %arg2: memref<1x32xf32, #tpu.memory_space<vmem>>, %arg3: memref<32x32xbf16, #tpu.memory_space<vmem>>, %arg4: memref<1x32xf32, #tpu.memory_space<vmem>>, %arg5: memref<2x32xf32, #tpu.memory_space<vmem>>) attributes {dimension_semantics = [], scalar_prefetch = 0 : i64, scratch_operands = 0 : i64, tpu.core_type = #tpu.core_type<tc>} {
    %c0 = arith.constant 0 : index
    %c0_0 = arith.constant 0 : index
    %0 = vector.load %arg0[%c0, %c0_0] : memref<2x32xf32, #tpu.memory_space<vmem>>, vector<2x32xf32>
    %cst = arith.constant dense<0.000000e+00> : vector<2xf32>
    %1 = vector.multi_reduction <add>, %0, %cst [1] : vector<2x32xf32> to vector<2xf32>
    %2 = vector.shape_cast %1 : vector<2xf32> to vector<2x1xf32>
    %cst_1 = arith.constant 3.200000e+01 : f32
    %3 = vector.broadcast %cst_1 : f32 to vector<2x1xf32>
    %4 = arith.divf %2, %3 : vector<2x1xf32>
    %5 = vector.broadcast %4 : vector<2x1xf32> to vector<2x32xf32>
    %6 = arith.subf %0, %5 : vector<2x32xf32>
    %7 = arith.mulf %6, %6 : vector<2x32xf32>
    %cst_2 = arith.constant dense<0.000000e+00> : vector<2xf32>
    %8 = vector.multi_reduction <add>, %7, %cst_2 [1] : vector<2x32xf32> to vector<2xf32>
    %9 = vector.shape_cast %8 : vector<2xf32> to vector<2x1xf32>
    %cst_3 = arith.constant 3.200000e+01 : f32
    %10 = vector.broadcast %cst_3 : f32 to vector<2x1xf32>
    %11 = arith.divf %9, %10 : vector<2x1xf32>
    %12 = vector.broadcast %4 : vector<2x1xf32> to vector<2x32xf32>
    %13 = arith.subf %0, %12 : vector<2x32xf32>
    %cst_4 = arith.constant 9.99999974E-6 : f32
    %14 = vector.broadcast %cst_4 : f32 to vector<2x1xf32>
    %15 = arith.addf %11, %14 : vector<2x1xf32>
    %16 = math.rsqrt %15 : vector<2x1xf32>
    %17 = vector.broadcast %16 : vector<2x1xf32> to vector<2x32xf32>
    %18 = arith.mulf %13, %17 : vector<2x32xf32>
    %c0_5 = arith.constant 0 : index
    %c0_6 = arith.constant 0 : index
    %19 = vector.load %arg1[%c0_5, %c0_6] : memref<1x32xf32, #tpu.memory_space<vmem>>, vector<1x32xf32>
    %20 = vector.broadcast %19 : vector<1x32xf32> to vector<2x32xf32>
    %21 = arith.mulf %18, %20 : vector<2x32xf32>
    %c0_7 = arith.constant 0 : index
    %c0_8 = arith.constant 0 : index
    %22 = vector.load %arg2[%c0_7, %c0_8] : memref<1x32xf32, #tpu.memory_space<vmem>>, vector<1x32xf32>
    %23 = vector.broadcast %22 : vector<1x32xf32> to vector<2x32xf32>
    %24 = arith.addf %21, %23 : vector<2x32xf32>
    %25 = arith.truncf %24 : vector<2x32xf32> to vector<2x32xbf16>
    %c0_9 = arith.constant 0 : index
    %c0_10 = arith.constant 0 : index
    %26 = vector.load %arg3[%c0_9, %c0_10] : memref<32x32xbf16, #tpu.memory_space<vmem>>, vector<32x32xbf16>
    %cst_11 = arith.constant dense<0.000000e+00> : vector<2x32xf32>
    %27 = tpu.matmul %25, %26, %cst_11 {dimension_numbers = #tpu.dot_dimension_numbers<[1], [0], [0], [1], [0, 0, 1, 1], [], []>} : vector<2x32xbf16>, vector<32x32xbf16>, vector<2x32xf32> -> vector<2x32xf32>
    %c0_12 = arith.constant 0 : index
    %c0_13 = arith.constant 0 : index
    %28 = vector.load %arg4[%c0_12, %c0_13] : memref<1x32xf32, #tpu.memory_space<vmem>>, vector<1x32xf32>
    %29 = vector.broadcast %28 : vector<1x32xf32> to vector<2x32xf32>
    %30 = arith.addf %27, %29 : vector<2x32xf32>
    %cst_14 = arith.constant 0.353553385 : f32
    %31 = vector.broadcast %cst_14 : f32 to vector<2x32xf32>
    %32 = arith.mulf %30, %31 : vector<2x32xf32>
    %c0_15 = arith.constant 0 : index
    %c0_16 = arith.constant 0 : index
    %33 = vector.load %arg5[%c0_15, %c0_16] : memref<2x32xf32, #tpu.memory_space<vmem>>, vector<2x32xf32>
    tpu.vector_store %arg5[%c0_15, %c0_16], %32 {strides = array<i32>} : memref<2x32xf32, #tpu.memory_space<vmem>>, vector<2x32xf32>,
    return
  }
}

module attributes {stable_mosaic.version = 11 : i64} {
  func.func @_cls_attn_kernel(%arg0: i32, %arg1: memref<1x1x32xf32, #tpu.memory_space<vmem>>, %arg2: memref<1x8x32xbf16, #tpu.memory_space<vmem>>, %arg3: memref<1x8x32xbf16, #tpu.memory_space<vmem>>, %arg4: memref<32x4xf32, #tpu.memory_space<vmem>>, %arg5: memref<1x1x32xf32, #tpu.memory_space<vmem>>) attributes {dimension_semantics = [#tpu.dimension_semantics<parallel>], iteration_bounds = array<i64: 2>, scalar_prefetch = 0 : i64, scratch_operands = 0 : i64, tpu.core_type = #tpu.core_type<tc>, window_params = [{transform_indices = @transform_0, window_bounds = array<i64: 1, 1, 32>}, {transform_indices = @transform_1, window_bounds = array<i64: 1, 8, 32>}, {transform_indices = @transform_2, window_bounds = array<i64: 1, 8, 32>}, {pipeline_mode = #tpu.pipeline_mode<synchronous>, transform_indices = @transform_3, window_bounds = array<i64: 32, 4>}, {transform_indices = @transform_4, window_bounds = array<i64: 1, 1, 32>}]} {
    %c0 = arith.constant 0 : index
    %c0_0 = arith.constant 0 : index
    %c0_1 = arith.constant 0 : index
    %0 = vector.load %arg1[%c0, %c0_0, %c0_1] : memref<1x1x32xf32, #tpu.memory_space<vmem>>, vector<1x1x32xf32>
    %1 = vector.shape_cast %0 : vector<1x1x32xf32> to vector<1x32xf32>
    %c0_2 = arith.constant 0 : index
    %c0_3 = arith.constant 0 : index
    %c0_4 = arith.constant 0 : index
    %2 = vector.load %arg2[%c0_2, %c0_3, %c0_4] : memref<1x8x32xbf16, #tpu.memory_space<vmem>>, vector<1x8x32xbf16>
    %3 = vector.shape_cast %2 : vector<1x8x32xbf16> to vector<8x32xbf16>
    %4 = arith.extf %3 : vector<8x32xbf16> to vector<8x32xf32>
    %c0_5 = arith.constant 0 : index
    %c0_6 = arith.constant 0 : index
    %c0_7 = arith.constant 0 : index
    %5 = vector.load %arg3[%c0_5, %c0_6, %c0_7] : memref<1x8x32xbf16, #tpu.memory_space<vmem>>, vector<1x8x32xbf16>
    %6 = vector.shape_cast %5 : vector<1x8x32xbf16> to vector<8x32xbf16>
    %7 = arith.extf %6 : vector<8x32xbf16> to vector<8x32xf32>
    %8 = vector.broadcast %1 : vector<1x32xf32> to vector<8x32xf32>
    %9 = arith.mulf %4, %8 : vector<8x32xf32>
    %c0_8 = arith.constant 0 : index
    %c0_9 = arith.constant 0 : index
    %10 = vector.load %arg4[%c0_8, %c0_9] : memref<32x4xf32, #tpu.memory_space<vmem>>, vector<32x4xf32>
    %cst = arith.constant dense<0.000000e+00> : vector<8x4xf32>
    %11 = tpu.matmul %9, %10, %cst {dimension_numbers = #tpu.dot_dimension_numbers<[1], [0], [0], [1], [0, 0, 1, 1], [], []>} : vector<8x32xf32>, vector<32x4xf32>, vector<8x4xf32> -> vector<8x4xf32>
    %cst_10 = arith.constant dense<0xFF800000> : vector<4xf32>
    %12 = vector.multi_reduction <maximumf>, %11, %cst_10 [0] : vector<8x4xf32> to vector<4xf32>
    %13 = vector.shape_cast %12 : vector<4xf32> to vector<1x4xf32>
    %14 = vector.broadcast %13 : vector<1x4xf32> to vector<8x4xf32>
    %15 = arith.subf %11, %14 : vector<8x4xf32>
    %16 = math.exp %15 : vector<8x4xf32>
    %cst_11 = arith.constant dense<0.000000e+00> : vector<4xf32>
    %17 = vector.multi_reduction <add>, %16, %cst_11 [0] : vector<8x4xf32> to vector<4xf32>
    %18 = vector.shape_cast %17 : vector<4xf32> to vector<1x4xf32>
    %19 = vector.broadcast %18 : vector<1x4xf32> to vector<8x4xf32>
    %20 = arith.divf %16, %19 : vector<8x4xf32>
    %c0_12 = arith.constant 0 : index
    %c0_13 = arith.constant 0 : index
    %21 = vector.load %arg4[%c0_12, %c0_13] : memref<32x4xf32, #tpu.memory_space<vmem>>, vector<32x4xf32>
    %cst_14 = arith.constant dense<0.000000e+00> : vector<8x32xf32>
    %22 = tpu.matmul %20, %21, %cst_14 {dimension_numbers = #tpu.dot_dimension_numbers<[1], [1], [0], [0], [0, 0, 1, 0], [], []>} : vector<8x4xf32>, vector<32x4xf32>, vector<8x32xf32> -> vector<8x32xf32>
    %23 = arith.mulf %22, %7 : vector<8x32xf32>
    %cst_15 = arith.constant dense<0.000000e+00> : vector<32xf32>
    %24 = vector.multi_reduction <add>, %23, %cst_15 [0] : vector<8x32xf32> to vector<32xf32>
    %25 = vector.shape_cast %24 : vector<32xf32> to vector<1x32xf32>
    %c0_16 = arith.constant 0 : index
    %c0_17 = arith.constant 0 : index
    %c0_18 = arith.constant 0 : index
    %26 = vector.load %arg5[%c0_16, %c0_17, %c0_18] : memref<1x1x32xf32, #tpu.memory_space<vmem>>, vector<1x1x32xf32>
    %27 = vector.shape_cast %26 : vector<1x1x32xf32> to vector<1x32xf32>
    %28 = vector.shape_cast %25 : vector<1x32xf32> to vector<1x1x32xf32>
    tpu.vector_store %arg5[%c0_16, %c0_17, %c0_18], %28 {strides = array<i32>} : memref<1x1x32xf32, #tpu.memory_space<vmem>>, vector<1x1x32xf32>,
    return
  }
  func.func @transform_0(%arg0: i32) -> (i32, i32, i32) {
    %c0_i32 = arith.constant 0 : i32
    %c0_i32_0 = arith.constant 0 : i32
    %c0_i32_1 = arith.constant 0 : i32
    return %arg0, %c0_i32, %c0_i32_0 : i32, i32, i32
  }
  func.func @transform_1(%arg0: i32) -> (i32, i32, i32) {
    %c0_i32 = arith.constant 0 : i32
    %c0_i32_0 = arith.constant 0 : i32
    %c0_i32_1 = arith.constant 0 : i32
    return %arg0, %c0_i32, %c0_i32_0 : i32, i32, i32
  }
  func.func @transform_2(%arg0: i32) -> (i32, i32, i32) {
    %c0_i32 = arith.constant 0 : i32
    %c0_i32_0 = arith.constant 0 : i32
    %c0_i32_1 = arith.constant 0 : i32
    return %arg0, %c0_i32, %c0_i32_0 : i32, i32, i32
  }
  func.func @transform_3(%arg0: i32) -> (i32, i32) {
    %c0_i32 = arith.constant 0 : i32
    %c0_i32_0 = arith.constant 0 : i32
    %c0_i32_1 = arith.constant 0 : i32
    return %c0_i32, %c0_i32_0 : i32, i32
  }
  func.func @transform_4(%arg0: i32) -> (i32, i32, i32) {
    %c0_i32 = arith.constant 0 : i32
    %c0_i32_0 = arith.constant 0 : i32
    %c0_i32_1 = arith.constant 0 : i32
    return %arg0, %c0_i32, %c0_i32_0 : i32, i32, i32
  }
}

module attributes {stable_mosaic.version = 11 : i64} {
  func.func @_cls_proj_ln2_fc1_kernel(%arg0: memref<2x32xf32, #tpu.memory_space<vmem>>, %arg1: memref<2x32xf32, #tpu.memory_space<vmem>>, %arg2: memref<32x32xbf16, #tpu.memory_space<vmem>>, %arg3: memref<1x32xf32, #tpu.memory_space<vmem>>, %arg4: memref<1x32xf32, #tpu.memory_space<vmem>>, %arg5: memref<1x32xf32, #tpu.memory_space<vmem>>, %arg6: memref<1x32xf32, #tpu.memory_space<vmem>>, %arg7: memref<32x128xbf16, #tpu.memory_space<vmem>>, %arg8: memref<1x128xf32, #tpu.memory_space<vmem>>, %arg9: memref<2x32xf32, #tpu.memory_space<vmem>>, %arg10: memref<2x128xf32, #tpu.memory_space<vmem>>) attributes {dimension_semantics = [], scalar_prefetch = 0 : i64, scratch_operands = 0 : i64, tpu.core_type = #tpu.core_type<tc>} {
    %c0 = arith.constant 0 : index
    %c0_0 = arith.constant 0 : index
    %0 = vector.load %arg0[%c0, %c0_0] : memref<2x32xf32, #tpu.memory_space<vmem>>, vector<2x32xf32>
    %1 = arith.truncf %0 : vector<2x32xf32> to vector<2x32xbf16>
    %c0_1 = arith.constant 0 : index
    %c0_2 = arith.constant 0 : index
    %2 = vector.load %arg2[%c0_1, %c0_2] : memref<32x32xbf16, #tpu.memory_space<vmem>>, vector<32x32xbf16>
    %cst = arith.constant dense<0.000000e+00> : vector<2x32xf32>
    %3 = tpu.matmul %1, %2, %cst {dimension_numbers = #tpu.dot_dimension_numbers<[1], [0], [0], [1], [0, 0, 1, 1], [], []>} : vector<2x32xbf16>, vector<32x32xbf16>, vector<2x32xf32> -> vector<2x32xf32>
    %c0_3 = arith.constant 0 : index
    %c0_4 = arith.constant 0 : index
    %4 = vector.load %arg3[%c0_3, %c0_4] : memref<1x32xf32, #tpu.memory_space<vmem>>, vector<1x32xf32>
    %5 = vector.broadcast %4 : vector<1x32xf32> to vector<2x32xf32>
    %6 = arith.addf %3, %5 : vector<2x32xf32>
    %c0_5 = arith.constant 0 : index
    %c0_6 = arith.constant 0 : index
    %7 = vector.load %arg1[%c0_5, %c0_6] : memref<2x32xf32, #tpu.memory_space<vmem>>, vector<2x32xf32>
    %c0_7 = arith.constant 0 : index
    %c0_8 = arith.constant 0 : index
    %8 = vector.load %arg4[%c0_7, %c0_8] : memref<1x32xf32, #tpu.memory_space<vmem>>, vector<1x32xf32>
    %9 = vector.broadcast %8 : vector<1x32xf32> to vector<2x32xf32>
    %10 = arith.mulf %9, %6 : vector<2x32xf32>
    %11 = arith.addf %7, %10 : vector<2x32xf32>
    %cst_9 = arith.constant dense<0.000000e+00> : vector<2xf32>
    %12 = vector.multi_reduction <add>, %11, %cst_9 [1] : vector<2x32xf32> to vector<2xf32>
    %13 = vector.shape_cast %12 : vector<2xf32> to vector<2x1xf32>
    %cst_10 = arith.constant 3.200000e+01 : f32
    %14 = vector.broadcast %cst_10 : f32 to vector<2x1xf32>
    %15 = arith.divf %13, %14 : vector<2x1xf32>
    %16 = vector.broadcast %15 : vector<2x1xf32> to vector<2x32xf32>
    %17 = arith.subf %11, %16 : vector<2x32xf32>
    %18 = arith.mulf %17, %17 : vector<2x32xf32>
    %cst_11 = arith.constant dense<0.000000e+00> : vector<2xf32>
    %19 = vector.multi_reduction <add>, %18, %cst_11 [1] : vector<2x32xf32> to vector<2xf32>
    %20 = vector.shape_cast %19 : vector<2xf32> to vector<2x1xf32>
    %cst_12 = arith.constant 3.200000e+01 : f32
    %21 = vector.broadcast %cst_12 : f32 to vector<2x1xf32>
    %22 = arith.divf %20, %21 : vector<2x1xf32>
    %23 = vector.broadcast %15 : vector<2x1xf32> to vector<2x32xf32>
    %24 = arith.subf %11, %23 : vector<2x32xf32>
    %cst_13 = arith.constant 9.99999974E-6 : f32
    %25 = vector.broadcast %cst_13 : f32 to vector<2x1xf32>
    %26 = arith.addf %22, %25 : vector<2x1xf32>
    %27 = math.rsqrt %26 : vector<2x1xf32>
    %28 = vector.broadcast %27 : vector<2x1xf32> to vector<2x32xf32>
    %29 = arith.mulf %24, %28 : vector<2x32xf32>
    %c0_14 = arith.constant 0 : index
    %c0_15 = arith.constant 0 : index
    %30 = vector.load %arg5[%c0_14, %c0_15] : memref<1x32xf32, #tpu.memory_space<vmem>>, vector<1x32xf32>
    %31 = vector.broadcast %30 : vector<1x32xf32> to vector<2x32xf32>
    %32 = arith.mulf %29, %31 : vector<2x32xf32>
    %c0_16 = arith.constant 0 : index
    %c0_17 = arith.constant 0 : index
    %33 = vector.load %arg6[%c0_16, %c0_17] : memref<1x32xf32, #tpu.memory_space<vmem>>, vector<1x32xf32>
    %34 = vector.broadcast %33 : vector<1x32xf32> to vector<2x32xf32>
    %35 = arith.addf %32, %34 : vector<2x32xf32>
    %c0_18 = arith.constant 0 : index
    %c0_19 = arith.constant 0 : index
    %36 = vector.load %arg9[%c0_18, %c0_19] : memref<2x32xf32, #tpu.memory_space<vmem>>, vector<2x32xf32>
    tpu.vector_store %arg9[%c0_18, %c0_19], %35 {strides = array<i32>} : memref<2x32xf32, #tpu.memory_space<vmem>>, vector<2x32xf32>,
    %37 = arith.truncf %35 : vector<2x32xf32> to vector<2x32xbf16>
    %c0_20 = arith.constant 0 : index
    %c0_21 = arith.constant 0 : index
    %38 = vector.load %arg7[%c0_20, %c0_21] : memref<32x128xbf16, #tpu.memory_space<vmem>>, vector<32x128xbf16>
    %cst_22 = arith.constant dense<0.000000e+00> : vector<2x128xf32>
    %39 = tpu.matmul %37, %38, %cst_22 {dimension_numbers = #tpu.dot_dimension_numbers<[1], [0], [0], [1], [0, 0, 1, 1], [], []>} : vector<2x32xbf16>, vector<32x128xbf16>, vector<2x128xf32> -> vector<2x128xf32>
    %c0_23 = arith.constant 0 : index
    %c0_24 = arith.constant 0 : index
    %40 = vector.load %arg8[%c0_23, %c0_24] : memref<1x128xf32, #tpu.memory_space<vmem>>, vector<1x128xf32>
    %41 = vector.broadcast %40 : vector<1x128xf32> to vector<2x128xf32>
    %42 = arith.addf %39, %41 : vector<2x128xf32>
    %c0_25 = arith.constant 0 : index
    %c0_26 = arith.constant 0 : index
    %43 = vector.load %arg10[%c0_25, %c0_26] : memref<2x128xf32, #tpu.memory_space<vmem>>, vector<2x128xf32>
    tpu.vector_store %arg10[%c0_25, %c0_26], %42 {strides = array<i32>} : memref<2x128xf32, #tpu.memory_space<vmem>>, vector<2x128xf32>,
    return
  }
}

module attributes {stable_mosaic.version = 11 : i64} {
  func.func @_cls_fc2_kernel(%arg0: memref<2x128xf32, #tpu.memory_space<vmem>>, %arg1: memref<128x32xbf16, #tpu.memory_space<vmem>>, %arg2: memref<1x32xf32, #tpu.memory_space<vmem>>, %arg3: memref<1x32xf32, #tpu.memory_space<vmem>>, %arg4: memref<2x32xf32, #tpu.memory_space<vmem>>, %arg5: memref<2x32xf32, #tpu.memory_space<vmem>>) attributes {dimension_semantics = [], scalar_prefetch = 0 : i64, scratch_operands = 0 : i64, tpu.core_type = #tpu.core_type<tc>} {
    %c0 = arith.constant 0 : index
    %c0_0 = arith.constant 0 : index
    %0 = vector.load %arg0[%c0, %c0_0] : memref<2x128xf32, #tpu.memory_space<vmem>>, vector<2x128xf32>
    %1 = arith.truncf %0 : vector<2x128xf32> to vector<2x128xbf16>
    %c0_1 = arith.constant 0 : index
    %c0_2 = arith.constant 0 : index
    %2 = vector.load %arg1[%c0_1, %c0_2] : memref<128x32xbf16, #tpu.memory_space<vmem>>, vector<128x32xbf16>
    %cst = arith.constant dense<0.000000e+00> : vector<2x32xf32>
    %3 = tpu.matmul %1, %2, %cst {dimension_numbers = #tpu.dot_dimension_numbers<[1], [0], [0], [1], [0, 0, 1, 1], [], []>} : vector<2x128xbf16>, vector<128x32xbf16>, vector<2x32xf32> -> vector<2x32xf32>
    %c0_3 = arith.constant 0 : index
    %c0_4 = arith.constant 0 : index
    %4 = vector.load %arg2[%c0_3, %c0_4] : memref<1x32xf32, #tpu.memory_space<vmem>>, vector<1x32xf32>
    %5 = vector.broadcast %4 : vector<1x32xf32> to vector<2x32xf32>
    %6 = arith.addf %3, %5 : vector<2x32xf32>
    %c0_5 = arith.constant 0 : index
    %c0_6 = arith.constant 0 : index
    %7 = vector.load %arg4[%c0_5, %c0_6] : memref<2x32xf32, #tpu.memory_space<vmem>>, vector<2x32xf32>
    %c0_7 = arith.constant 0 : index
    %c0_8 = arith.constant 0 : index
    %8 = vector.load %arg3[%c0_7, %c0_8] : memref<1x32xf32, #tpu.memory_space<vmem>>, vector<1x32xf32>
    %9 = vector.broadcast %8 : vector<1x32xf32> to vector<2x32xf32>
    %10 = arith.mulf %9, %6 : vector<2x32xf32>
    %11 = arith.addf %7, %10 : vector<2x32xf32>
    %c0_9 = arith.constant 0 : index
    %c0_10 = arith.constant 0 : index
    %12 = vector.load %arg5[%c0_9, %c0_10] : memref<2x32xf32, #tpu.memory_space<vmem>>, vector<2x32xf32>
    tpu.vector_store %arg5[%c0_9, %c0_10], %11 {strides = array<i32>} : memref<2x32xf32, #tpu.memory_space<vmem>>, vector<2x32xf32>,
    return
  }
}

</mosaic_0001>

<bundles_post_ra>
// kernel: class_attention_block_forward.6
= control target key start
LH: loop header
LB: loop body
LE: loop exit
PB: predicated region body
PF: predicated region fallthrough
CT: control target
= control target key end

     0   :  { %vm22_vm0 = vcmask 254976   ;;  %v150_v8 = vmov 0.0   ;;  %vm151_vm1 = vmmov 0   ;;  %vm77_vm2 = vcmask 261120   ;;  %s206_s0 = inlined_call_operand.vmem [shape: f32[2,32], index: 0, kind: input, shape index: {}]   ;;  %s207_s3 = inlined_call_operand.vmem [shape: bf16[32,32], index: 3, kind: input, shape index: {}]   ;;  %s208_s1 = inlined_call_operand.vmem [shape: f32[1,32], index: 1, kind: input, shape index: {}]   ;;  %s209_s2 = inlined_call_operand.vmem [shape: f32[1,32], index: 2, kind: input, shape index: {}]   ;;  %s210_s4 = inlined_call_operand.vmem [shape: f32[1,32], index: 4, kind: input, shape index: {}]   ;;  %s211_s5 = inlined_call_operand.vmem [shape: f32[2,32], index: 5, kind: output, shape index: {}]  }
   0x1   :  { %v21_v0 = vld [vmem:[%s206_s0] sm:$0x3]  ;;  %136 = vmatprep.subr.bf16.mxu0 %v150_v8  ;;  %v147_v9 = vld [vmem:[%s207_s3 + $0x8] sm:$0xff]   ;;  %140 = vmatprep.mubr.msk.bf16.mxu0 %vm151_vm1, %v150_v8 }
   0x2   :  { %v23_v1 = vsel %vm22_vm0, %v21_v0, 0.0  ;;  %v146_v7 = vld [vmem:[%s207_s3] sm:$0xff]  }
   0x3   :  { %24 = vadd.xlane.f32.xlu0 %v23_v1  ;;  %137 = vmatpush3.bf16.msra.mxu0 %v146_v7  ;;  %v127_v14 = vld [vmem:[%s208_s1] ss:$0 sm:$0xff] }
   0x4   :  { %138 = vmatprep.subr.bf16.mxu0 %v150_v8  ;;  %v128_v16 = vld [vmem:[%s209_s2] ss:$0 sm:$0xff] }
   0x5   :  { %v129_v20 = vld [vmem:[%s210_s4] ss:$0 sm:$0xff] }
   0x7   :  { %139 = vmatpush3.bf16.msra.mxu0 %v147_v9 }
  0x90   :  { %v25_v2 = vpop.xlane.xlu0 %24 }
  0x91   :  { %v27_v3 = vmul.f32 0.03125, %v25_v2 }
  0x93   :  { %v28_v4 = vsub.f32 %v21_v0, %v27_v3 }
  0x95   :  { %v29_v5 = vmul.f32 %v28_v4, %v28_v4 }
  0x97   :  { %v30_v6 = vsel %vm22_vm0, %v29_v5, 0.0 }
  0x98   :  { %31 = vadd.xlane.f32.xlu0 %v30_v6 }
 0x125   :  { %v32_v10 = vpop.xlane.xlu0 %31 }
 0x126   :  { %v33_v11 = vmul.f32 0.03125, %v32_v10 }
 0x128   :  { %v34_v12 = vadd.f32 1e-05, %v33_v11 }
 0x12a   :  { %148 = vrsqrt.f32 %v34_v12 }
 0x134   :  { %v149_v13 = vpop.eup %148 }
 0x135   :  { %v36_v15 = vmul.f32 %v149_v13, %v28_v4 }
 0x137   :  { %v44_v17 = vmul.f32 %v127_v14, %v36_v15 }
 0x139   :  { %v52_v18 = vadd.f32 %v128_v16, %v44_v17 }
 0x13b   :  { %v53_v19 = vpack.c.bf16 %v52_v18, %v52_v18 }
 0x13d   :  { %141 = vmatmul.mubr.msk.bf16.vlgmr.msra.gmra.mrb[0].mxu0 %vm77_vm2, %v53_v19 }
 0x210   :  { %v115_v21 = vpop.f32.mrb[0].mxu0 }
 0x211   :  { %v116_v22 = vadd.f32 %v129_v20, %v115_v21  ;;  %v142_v23 = vpop.f32.mrb[1].mxu0 }
 0x212   :  { %v118_v24 = vpop.f32.mrb[2].mxu0 }
 0x213   :  { %v121_v25 = vmul.f32 0.35355338, %v116_v22  ;;  %v143_v26 = vpop.f32.mrb[3].mxu0 }
 0x215   :  { %122 = vst.msk [vmem:[%s211_s5] sm:$0x3] %vm22_vm0, %v121_v25 }

// kernel: class_attention_block_forward.7
= control target key start
LH: loop header
LB: loop body
LE: loop exit
PB: predicated region body
PF: predicated region fallthrough
CT: control target
= control target key end

     0   :  { %s608_s15 = smov 0   ;;  %s659_s0 = inlined_call_operand.vmem [shape: f32[2,1,32], index: 0, kind: input, shape index: {}]   ;;  %s660_s1 = inlined_call_operand.vmem [shape: bf16[2,8,32], index: 1, kind: input, shape index: {}]   ;;  %s661_s2 = inlined_call_operand.vmem [shape: bf16[2,8,32], index: 2, kind: input, shape index: {}]   ;;  %s662_s3 = inlined_call_operand.vmem [shape: f32[32,4], index: 3, kind: input, shape index: {}]   ;;  %s663_s4 = inlined_call_operand.vmem [shape: f32[2,1,32], index: 4, kind: output, shape index: {}]  }
   0x1 LB: > { %s495_s16 = sadd.s32 4294967295, %s578_s15   ;;  %p499_p0 = scmp.ge.s32.totalorder %s578_s15, 1  ;;  %s578_s15 = sphi %s608_s15, %s14_s15  }
   0x2   : > { %p178_p1 = scmp.lt.s32.totalorder %s578_s15, 3 }
   0x4   : > { %p179_p2 = pnand %p499_p0, %p178_p1 }
   0x5   : > { %v234_v0 = vld [vmem:[%s662_s3] sm:$0xff] (!%p179_p2)  ;;  %v235_v1 = vld [vmem:[%s662_s3 + $0x8] sm:$0xff] (!%p179_p2)  ;;  %v236_v2 = vld [vmem:[%s662_s3 + $0x10] sm:$0xff] (!%p179_p2)  ;;  %v580_v3 = vmov (!%p179_p2), 0.0|0.0   ;;  %vm581_vm0 = vmmov (!%p179_p2), 0   ;;  %v582_v6 = vmov (!%p179_p2), 0.0  }
   0x6   : > { %182 = sbr.rel (%p179_p2) target bundleno = 515 (0x203), region = 36  ;;  %543 = vmatprep.subr.bf16.mxu0 (!%p179_p2), %v580_v3  ;;  %v544_v4 = vpack.c.bf16 (!%p179_p2), %v235_v1, %v234_v0  ;;  %v237_v5 = vld [vmem:[%s662_s3 + $0x18] sm:$0xff] (!%p179_p2)  ;;  %529 = vmatprep.mubr.msk.f32.mxu0 (!%p179_p2), %vm581_vm0, %v582_v6  ;;  %p208_p3 = scmp.lt.s32.totalorder (!%p179_p2), %s495_s16, 1  ;;  %vm238_vm1 = vcmask (!%p179_p2), 261120   ;;  %vm312_vm2 = vcmask (!%p179_p2), 31744   ;;  %vm425_vm4 = vcmask (!%p179_p2), 253952  }
   0x7   : > { %549 = vmatprep.subr.bf16.mxu1 (!%p179_p2), %v580_v3  ;;  %540 = vmatprep.mubr.msk.f32.mxu1 (!%p179_p2), %vm581_vm0, %v582_v6  ;;  %v547_v7 = vpack.c.bf16 (!%p179_p2), %v237_v5, %v236_v2  ;;  %vm551_vm3 = vmpackc.low (!%p179_p2), %vm312_vm2, %vm312_vm2 }
   0x8   : > { %545 = vmatpush3.bf16.msra.mxu0 (!%p179_p2), %v544_v4  ;;  %552 = vmatpush3.bf16.xpose.msk.msra.mxu1 (!%p179_p2), %vm551_vm3, %v544_v4 }
   0x9   : > { %546 = vmatprep.subr.bf16.mxu0 (!%p179_p2), %v580_v3  ;;  %553 = vmatprep.subr.bf16.mxu1 (!%p179_p2), %v580_v3 }
   0xc   : > { %548 = vmatpush3.bf16.msra.mxu0 (!%p179_p2), %v547_v7 }
   0xd   : > { %s665_s16 = smov (!%p208_p3, %s495_s16), 1 }
   0xe   : > { %s210_s27 = scalar_lea.vmem %s659_s0, %s665_s16  ;;  %s500_s28 = sshll.u32 %s665_s16, 2 }
   0xf   : > { %s214_s5 = scalar_lea.vmem %s660_s1, %s500_s28  ;;  %v502_v8 = vld [vmem:[%s210_s27] ss:$0 sm:$0xff]  ;;  %s218_s8 = scalar_lea.vmem %s661_s2, %s500_s28 }
  0x10   : > { %v223_v9 = vld [vmem:[%s214_s5] sm:$0xf]  ;;  %556 = vmatpush3.bf16.xpose.msk.msra.mxu1 %vm551_vm3, %v547_v7  ;;  %s221_s11 = scalar_lea.vmem %s663_s4, %s665_s16 }
  0x11   : > { %v224_v10 = vunpack.c.l.bf16 %v223_v9  ;;  %v225_v33 = vld [vmem:[%s218_s8] sm:$0xf] }
  0x12   : > { %v226_v34 = vunpack.c.l.bf16 %v225_v33 }
  0x13   : > { %v233_v11 = vmul.f32 %v502_v8, %v224_v10 }
  0x15   : > { %530 = vmatmul.mubr.msk.f32.vlgmr.msra.gmra.mrb[0].mxu0 %vm238_vm1, %v233_v11 }
  0xe8   : > { %v308_v12 = vpop.f32.mrb[0].mxu0 }
  0xe9   : > { %v313_v13 = vsel %vm312_vm2, %v308_v12, -inf  ;;  %v531_v14 = vpop.f32.mrb[1].mxu0 }
  0xea   : > { %v314_v15 = vrot.slane %v313_v13, 4 }
  0xec   : > { %v315_v16 = vmax.f32 %v313_v13, %v314_v15 }
  0xee   : > { %v316_v17 = vrot.slane %v315_v16, 2 }
  0xf0   : > { %v317_v18 = vmax.f32 %v315_v16, %v316_v17 }
  0xf2   : > { %v318_v19 = vrot.slane %v317_v18, 1 }
  0xf4   : > { %v319_v20 = vmax.f32 %v317_v18, %v318_v19 }
  0xf6   : > { %v320_v21 = vsub.f32 %v308_v12, %v319_v20 }
  0xf8   : > { %v321_v22 = vmul.f32 1.442695, %v320_v21 }
  0xfa   : > { %568 = vpow2.f32 %v321_v22 }
 0x104   : > { %v569_v23 = vpop.eup %568 }
 0x105   : > { %v323_v24 = vsel %vm312_vm2, %v569_v23, 0.0 }
 0x106   : > { %v324_v25 = vrot.slane %v323_v24, 4 }
 0x108   : > { %v325_v26 = vadd.f32 %v324_v25, %v323_v24 }
 0x10a   : > { %v326_v27 = vrot.slane %v325_v26, 2 }
 0x10c   : > { %v327_v28 = vadd.f32 %v326_v27, %v325_v26 }
 0x10e   : > { %v328_v29 = vrot.slane %v327_v28, 1 }
 0x110   : > { %v329_v30 = vadd.f32 %v328_v29, %v327_v28 }
 0x112   : > { %570 = vrcp.f32 %v329_v30 }
 0x11c   : > { %v571_v31 = vpop.eup %570 }
 0x11d   : > { %v331_v32 = vmul.f32 %v571_v31, %v569_v23 }
 0x11f   : > { %541 = vmatmul.mubr.msk.f32.vlgmr.msra.gmra.mrb[0].mxu1 %vm312_vm2, %v331_v32 }
 0x1f2   : > { %v413_v35 = vpop.f32.mrb[0].mxu1 }
 0x1f3   : > { %v417_v36 = vmul.f32 %v413_v35, %v226_v34  ;;  %v542_v37 = vpop.f32.mrb[1].mxu1 }
 0x1f5   : > { %v418_v38 = vsel %vm238_vm1, %v417_v36, 0.0 }
 0x1f6   : > { %v419_v39 = vrot.slane %v418_v38, 4 }
 0x1f8   : > { %v420_v40 = vadd.f32 %v419_v39, %v418_v38 }
 0x1fa   : > { %v421_v41 = vrot.slane %v420_v40, 2 }
 0x1fc   : > { %v422_v42 = vadd.f32 %v421_v41, %v420_v40 }
 0x1fe   : > { %v423_v43 = vrot.slane %v422_v42, 1 }
 0x200   : > { %v424_v44 = vadd.f32 %v423_v43, %v422_v42 }
 0x202   : > { %426 = vst.msk [vmem:[%s221_s11] sm:$0x1] %vm425_vm4, %v424_v44 }
 0x203 PF: > { %s14_s15 = sadd.s32 1, %s578_s15  }
 0x204   : > { %p11_p4 = scmp.ge.s32.totalorder %s14_s15, 4  }
 0x206   :  { %13 = sbr.rel (!%p11_p4) target bundleno = 1 (0x1), region = 72 }

// kernel: class_attention_block_forward.8
= control target key start
LH: loop header
LB: loop body
LE: loop exit
PB: predicated region body
PF: predicated region fallthrough
CT: control target
= control target key end

     0   :  { %v263_v0 = vmov 0.0   ;;  %vm264_vm0 = vmmov 0   ;;  %vm60_vm1 = vcmask 261120   ;;  %vm114_vm2 = vcmask 254976   ;;  %s364_s2 = inlined_call_operand.vmem [shape: bf16[32,32], index: 2, kind: input, shape index: {}]   ;;  %s365_s0 = inlined_call_operand.vmem [shape: f32[2,32], index: 0, kind: input, shape index: {}]   ;;  %s366_s3 = inlined_call_operand.vmem [shape: f32[1,32], index: 3, kind: input, shape index: {}]   ;;  %s367_s4 = inlined_call_operand.vmem [shape: f32[1,32], index: 4, kind: input, shape index: {}]   ;;  %s368_s1 = inlined_call_operand.vmem [shape: f32[2,32], index: 1, kind: input, shape index: {}]   ;;  %s369_s7 = inlined_call_operand.vmem [shape: bf16[32,128], index: 7, kind: input, shape index: {}]   ;;  %s370_s5 = inlined_call_operand.vmem [shape: f32[1,32], index: 5, kind: input, shape index: {}]   ;;  %s371_s6 = inlined_call_operand.vmem [shape: f32[1,32], index: 6, kind: input, shape index: {}]   ;;  %s372_s9 = inlined_call_operand.vmem [shape: f32[2,32], index: 9, kind: output, shape index: {0}]   ;;  %s373_s8 = inlined_call_operand.vmem [shape: f32[1,128], index: 8, kind: input, shape index: {}]   ;;  %s374_s10 = inlined_call_operand.vmem [shape: f32[2,128], index: 10, kind: output, shape index: {1}]  }
   0x1   :  { %239 = vmatprep.subr.bf16.mxu0 %v263_v0  ;;  %v257_v1 = vld [vmem:[%s364_s2] sm:$0xff]   ;;  %243 = vmatprep.mubr.msk.bf16.mxu0 %vm264_vm0, %v263_v0  ;;  %v258_v2 = vld [vmem:[%s364_s2 + $0x8] sm:$0xff]  }
   0x2   :  { %247 = vmatprep.subr.bf16.mxu1 %v263_v0  ;;  %251 = vmatprep.mubr.msk.bf16.mxu1 %vm264_vm0, %v263_v0  ;;  %v35_v3 = vld [vmem:[%s365_s0] sm:$0x3]  ;;  %v260_v22 = vld [vmem:[%s369_s7 + $0x8] sm:$0xff]  }
   0x3   :  { %240 = vmatpush3.bf16.msra.mxu0 %v257_v1  ;;  %v36_v4 = vpack.c.bf16 %v35_v3, %v35_v3  ;;  %v222_v5 = vld [vmem:[%s366_s3] ss:$0 sm:$0xff] }
   0x4   :  { %241 = vmatprep.subr.bf16.mxu0 %v263_v0  ;;  %v226_v7 = vld [vmem:[%s367_s4] ss:$0 sm:$0xff] }
   0x5   :  { %v104_v11 = vld [vmem:[%s368_s1] sm:$0x3] }
   0x6   :  { %v259_v21 = vld [vmem:[%s369_s7] sm:$0xff]  }
   0x7   :  { %242 = vmatpush3.bf16.msra.mxu0 %v258_v2  ;;  %248 = vmatpush3.bf16.msra.mxu1 %v259_v21  ;;  %v227_v27 = vld [vmem:[%s370_s5] ss:$0 sm:$0xff] }
   0x8   :  { %249 = vmatprep.subr.bf16.mxu1 %v263_v0  ;;  %v228_v29 = vld [vmem:[%s371_s6] ss:$0 sm:$0xff] }
   0x9   :  { %v229_v33 = vld [vmem:[%s373_s8] ss:$0 sm:$0xff] }
   0xa   :  { %244 = vmatmul.mubr.msk.bf16.vlgmr.msra.gmra.mrb[0].mxu0 %vm60_vm1, %v36_v4 }
   0xb   :  { %250 = vmatpush3.bf16.msra.mxu1 %v260_v22 }
  0xdd   :  { %v98_v6 = vpop.f32.mrb[0].mxu0 }
  0xde   :  { %v99_v8 = vadd.f32 %v222_v5, %v98_v6  ;;  %v245_v9 = vpop.f32.mrb[1].mxu0 }
  0xdf   :  { %v101_v10 = vpop.f32.mrb[2].mxu0 }
  0xe0   :  { %v112_v12 = vmul.f32 %v226_v7, %v99_v8  ;;  %v246_v13 = vpop.f32.mrb[3].mxu0 }
  0xe2   :  { %v113_v14 = vadd.f32 %v112_v12, %v104_v11 }
  0xe4   :  { %v115_v15 = vsel %vm114_vm2, %v113_v14, 0.0 }
  0xe5   :  { %116 = vadd.xlane.f32.xlu0 %v115_v15 }
 0x172   :  { %v117_v16 = vpop.xlane.xlu0 %116 }
 0x173   :  { %v119_v17 = vmul.f32 0.03125, %v117_v16 }
 0x175   :  { %v120_v18 = vsub.f32 %v113_v14, %v119_v17 }
 0x177   :  { %v121_v19 = vmul.f32 %v120_v18, %v120_v18 }
 0x179   :  { %v122_v20 = vsel %vm114_vm2, %v121_v19, 0.0 }
 0x17a   :  { %123 = vadd.xlane.f32.xlu0 %v122_v20 }
 0x207   :  { %v124_v23 = vpop.xlane.xlu0 %123 }
 0x208   :  { %v125_v24 = vmul.f32 0.03125, %v124_v23 }
 0x20a   :  { %v126_v25 = vadd.f32 1e-05, %v125_v24 }
 0x20c   :  { %261 = vrsqrt.f32 %v126_v25 }
 0x216   :  { %v262_v26 = vpop.eup %261 }
 0x217   :  { %v128_v28 = vmul.f32 %v262_v26, %v120_v18 }
 0x219   :  { %v136_v30 = vmul.f32 %v227_v27, %v128_v28 }
 0x21b   :  { %v144_v31 = vadd.f32 %v228_v29, %v136_v30 }
 0x21d   :  { %145 = vst.msk [vmem:[%s372_s9] sm:$0x3] %vm114_vm2, %v144_v31  ;;  %v146_v32 = vpack.c.bf16 %v144_v31, %v144_v31 }
 0x21f   :  { %252 = vmatmul.mubr.msk.bf16.vlgmr.msra.gmra.mrb[0].mxu1 %vm60_vm1, %v146_v32 }
 0x2f2   :  { %v207_v34 = vpop.f32.mrb[0].mxu1 }
 0x2f3   :  { %v208_v35 = vadd.f32 %v229_v33, %v207_v34  ;;  %v253_v36 = vpop.f32.mrb[1].mxu1 }
 0x2f4   :  { %v210_v37 = vpop.f32.mrb[2].mxu1 }
 0x2f5   :  { %213 = vst [vmem:[%s374_s10] sm:$0x3] %v208_v35  ;;  %v254_v38 = vpop.f32.mrb[3].mxu1 }

// kernel: class_attention_block_forward.5
= control target key start
LH: loop header
LB: loop body
LE: loop exit
PB: predicated region body
PF: predicated region fallthrough
CT: control target
= control target key end

     0   :  { %vm42_vm0 = vcmask 261120   ;;  %s553_s0 = inlined_call_operand.vmem [shape: f32[16,32], index: 0, kind: input, shape index: {}]   ;;  %s554_s1 = inlined_call_operand.vmem [shape: f32[1,32], index: 1, kind: input, shape index: {}]   ;;  %s555_s2 = inlined_call_operand.vmem [shape: f32[1,32], index: 2, kind: input, shape index: {}]   ;;  %s556_s3 = inlined_call_operand.vmem [shape: f32[1,32], index: 3, kind: input, shape index: {}]   ;;  %s557_s4 = inlined_call_operand.vmem [shape: f32[1,32], index: 4, kind: input, shape index: {}]   ;;  %s558_s5 = inlined_call_operand.vmem [shape: f32[1,32], index: 5, kind: input, shape index: {}]   ;;  %s559_s6 = inlined_call_operand.vmem [shape: bf16[32,32], index: 6, kind: input, shape index: {}]   ;;  %s560_s7 = inlined_call_operand.vmem [shape: f32[1,32], index: 7, kind: input, shape index: {}]   ;;  %s561_s8 = inlined_call_operand.vmem [shape: bf16[32,32], index: 8, kind: input, shape index: {}]   ;;  %s562_s9 = inlined_call_operand.vmem [shape: f32[1,32], index: 9, kind: input, shape index: {}]   ;;  %s563_s10 = inlined_call_operand.vmem [shape: bf16[16,32], index: 10, kind: output, shape index: {0}]   ;;  %s564_s11 = inlined_call_operand.vmem [shape: bf16[16,32], index: 11, kind: output, shape index: {1}]   ;;  %s565_s12 = inlined_call_operand.hbm [shape: f32[16,32], index: 12, kind: output, shape index: {2}]  }
   0x1   :  { %v40_v0 = vld [vmem:[%s553_s0] sm:$0xff]  ;;  %v41_v1 = vld [vmem:[%s553_s0 + $0x8] sm:$0xff] }
   0x2   :  { %v43_v2 = vsel %vm42_vm0, %v40_v0, 0.0  ;;  %v46_v3 = vsel %vm42_vm0, %v41_v1, 0.0 }
   0x3   :  { %44 = vadd.xlane.f32.xlu0 %v43_v2 }
   0x4   :  { %18 = vsyncpa [#allocation3], 0  ;;  %v372_v14 = vld [vmem:[%s559_s6] sm:$0xff]   ;;  %v408_v16 = vmov 0.0   ;;  %v374_v17 = vld [vmem:[%s559_s6 + $0x8] sm:$0xff]   ;;  %vm409_vm1 = vmmov 0  }
   0x5   :  { %v373_v15 = vld [vmem:[%s561_s8] sm:$0xff]   ;;  %351 = vmatprep.subr.bf16.mxu0 %v408_v16  ;;  %359 = vmatprep.subr.bf16.mxu1 %v408_v16  ;;  %v375_v18 = vld [vmem:[%s561_s8 + $0x8] sm:$0xff]   ;;  %vm164_vm2 = vcmask 257024  }
   0x6   :  { %352 = vmatpush3.bf16.msra.mxu0 %v372_v14  ;;  %360 = vmatpush3.bf16.msra.mxu1 %v373_v15  ;;  %v324_v26 = vld [vmem:[%s554_s1] ss:$0 sm:$0xff] }
   0x7   :  { %47 = vadd.xlane.f32.xlu0 %v46_v3  ;;  %353 = vmatprep.subr.bf16.mxu0 %v408_v16  ;;  %v325_v28 = vld [vmem:[%s555_s2] ss:$0 sm:$0xff] }
   0x8   :  { %361 = vmatprep.subr.bf16.mxu1 %v408_v16  ;;  %355 = vmatprep.mubr.msk.bf16.mxu0 %vm409_vm1, %v408_v16  ;;  %v338_v31 = vld [vmem:[%s558_s5] ss:$0 sm:$0xff] }
   0x9   :  { %363 = vmatprep.mubr.msk.bf16.mxu1 %vm409_vm1, %v408_v16  ;;  %v326_v53 = vld [vmem:[%s560_s7] ss:$0 sm:$0xff] }
   0xa   :  { %354 = vmatpush3.bf16.msra.mxu0 %v374_v17  ;;  %362 = vmatpush3.bf16.msra.mxu1 %v375_v18  ;;  %v332_v54 = vld [vmem:[%s562_s9] ss:$0 sm:$0xff] }
   0xb   :  { %v339_v14 = vld [vmem:[%s556_s3] ss:$0 sm:$0xff] }
   0xc   :  { %v340_v16 = vld [vmem:[%s557_s4] ss:$0 sm:$0xff] }
  0x90   :  { %v45_v4 = vpop.xlane.xlu0 %44 }
  0x91   :  { %v50_v5 = vmul.f32 0.03125, %v45_v4 }
  0x93   :  { %v52_v6 = vsub.f32 %v40_v0, %v50_v5 }
  0x94   :  { %v48_v7 = vpop.xlane.xlu0 %47 }
  0x95   :  { %v51_v8 = vmul.f32 0.03125, %v48_v7  ;;  %v54_v9 = vmul.f32 %v52_v6, %v52_v6 }
  0x97   :  { %v53_v10 = vsub.f32 %v41_v1, %v51_v8  ;;  %v56_v11 = vsel %vm42_vm0, %v54_v9, 0.0 }
  0x98   :  { %57 = vadd.xlane.f32.xlu1 %v56_v11 }
  0x99   :  { %v55_v12 = vmul.f32 %v53_v10, %v53_v10 }
  0x9b   :  { %v59_v13 = vsel %vm42_vm0, %v55_v12, 0.0 }
  0x9c   :  { %60 = vadd.xlane.f32.xlu1 %v59_v13 }
 0x125   :  { %v58_v19 = vpop.xlane.xlu1 %57 }
 0x126   :  { %v62_v20 = vmul.f32 0.03125, %v58_v19 }
 0x128   :  { %v64_v21 = vadd.f32 1e-05, %v62_v20 }
 0x129   :  { %v61_v22 = vpop.xlane.xlu1 %60 }
 0x12a   :  { %376 = vrsqrt.f32 %v64_v21  ;;  %v63_v23 = vmul.f32 0.03125, %v61_v22 }
 0x12c   :  { %v65_v24 = vadd.f32 1e-05, %v63_v23 }
 0x12e   :  { %378 = vrsqrt.f32 %v65_v24 }
 0x134   :  { %v377_v25 = vpop.eup %376 }
 0x135   :  { %v68_v27 = vmul.f32 %v377_v25, %v52_v6 }
 0x137   :  { %v77_v29 = vmul.f32 %v324_v26, %v68_v27 }
 0x138   :  { %v379_v30 = vpop.eup %378 }
 0x139   :  { %v86_v32 = vadd.f32 %v325_v28, %v77_v29  ;;  %v69_v33 = vmul.f32 %v379_v30, %v53_v10 }
 0x13b   :  { %v248_v34 = vmul.f32 %v338_v31, %v86_v32  ;;  %v78_v35 = vmul.f32 %v324_v26, %v69_v33 }
 0x13d   :  { %v250_v36 = vadd.f32 %v248_v34, %v40_v0  ;;  %v87_v37 = vadd.f32 %v325_v28, %v78_v35 }
 0x13f   :  { %v252_v38 = vsel %vm42_vm0, %v250_v36, 0.0  ;;  %v88_v39 = vpack.c.bf16 %v87_v37, %v86_v32  ;;  %v249_v40 = vmul.f32 %v338_v31, %v87_v37 }
 0x140   :  { %253 = vadd.xlane.f32.xlu0 %v252_v38 }
 0x141   :  { %356 = vmatmul.mubr.msk.bf16.vlgmr.msra.gmra.mrb[0].mxu0 %vm42_vm0, %v88_v39  ;;  %364 = vmatmul.mubr.msk.bf16.vlgmr.msra.gmra.mrb[0].mxu1 %vm42_vm0, %v88_v39  ;;  %v251_v41 = vadd.f32 %v249_v40, %v41_v1 }
 0x143   :  { %v255_v42 = vsel %vm42_vm0, %v251_v41, 0.0 }
 0x144   :  { %256 = vadd.xlane.f32.xlu1 %v255_v42 }
 0x1cd   :  { %v254_v43 = vpop.xlane.xlu0 %253 }
 0x1ce   :  { %v258_v44 = vmul.f32 0.03125, %v254_v43 }
 0x1d0   :  { %v260_v45 = vsub.f32 %v250_v36, %v258_v44 }
 0x1d1   :  { %v257_v46 = vpop.xlane.xlu1 %256 }
 0x1d2   :  { %v259_v47 = vmul.f32 0.03125, %v257_v46  ;;  %v262_v48 = vmul.f32 %v260_v45, %v260_v45 }
 0x1d4   :  { %v261_v49 = vsub.f32 %v251_v41, %v259_v47  ;;  %v264_v50 = vsel %vm42_vm0, %v262_v48, 0.0 }
 0x1d5   :  { %265 = vadd.xlane.f32.xlu0 %v264_v50 }
 0x1d6   :  { %v263_v51 = vmul.f32 %v261_v49, %v261_v49 }
 0x1d8   :  { %v267_v52 = vsel %vm42_vm0, %v263_v51, 0.0 }
 0x1d9   :  { %268 = vadd.xlane.f32.xlu1 %v267_v52 }
 0x214   :  { %v149_v55 = vpop.f32.mrb[0].mxu0  ;;  %v224_v56 = vpop.f32.mrb[0].mxu1 }
 0x215   :  { %v150_v57 = vadd.f32 %v326_v53, %v149_v55  ;;  %v225_v58 = vadd.f32 %v332_v54, %v224_v56  ;;  %v357_v59 = vpop.f32.mrb[1].mxu0  ;;  %v365_v60 = vpop.f32.mrb[1].mxu1 }
 0x216   :  { %v152_v61 = vpop.f32.mrb[2].mxu0  ;;  %v227_v62 = vpop.f32.mrb[2].mxu1 }
 0x217   :  { %v341_v63 = vpack.c.bf16 %v150_v57, %v150_v57  ;;  %v343_v0 = vpack.c.bf16 %v225_v58, %v225_v58  ;;  %v153_v1 = vadd.f32 %v326_v53, %v152_v61  ;;  %v228_v2 = vadd.f32 %v332_v54, %v227_v62  ;;  %v358_v3 = vpop.f32.mrb[3].mxu0  ;;  %v366_v4 = vpop.f32.mrb[3].mxu1 }
 0x219   :  { %165 = vst.msk [vmem:[%s563_s10] sm:$0xf] %vm164_vm2, %v341_v63  ;;  %239 = vst.msk [vmem:[%s564_s11] sm:$0xf] %vm164_vm2, %v343_v0  ;;  %v342_v5 = vpack.c.bf16 %v153_v1, %v153_v1  ;;  %v344_v6 = vpack.c.bf16 %v228_v2, %v228_v2 }
 0x21b   :  { %166 = vst.msk [vmem:[%s563_s10 + $0x4] sm:$0xf] %vm164_vm2, %v342_v5  ;;  %240 = vst.msk [vmem:[%s564_s11 + $0x4] sm:$0xf] %vm164_vm2, %v344_v6  ;;  %s410_s11 = smov [#allocation2]  }
 0x21c   :  { %s309_s27 = sshll.u32 %s410_s11, 4  ;;  %s310_s27 = int_to_ptr.vmem [resolvable:$true] %s309_s27 }
 0x21d   :  { %s384_s3 = scalar_lea.vmem %s310_s27, 256  ;;  %p389_p1 = scmp.lt.s32.totalorder %s310_s27, %s310_s27 }
 0x21e   :  { %p385_p0 = scmp.ne.s32.totalorder %s310_s27, %s384_s3  ;;  %p390_p2 = scmp.lt.s32.totalorder %s384_s3, %s384_s3 }
 0x220   :  { %p391_p3 = por %p390_p2, %p389_p1 }
 0x222   :  { %p392_p4 = pnand %p391_p3, %p385_p0 }
 0x262   :  { %v266_v7 = vpop.xlane.xlu0 %265 }
 0x263   :  { %v270_v8 = vmul.f32 0.03125, %v266_v7 }
 0x265   :  { %v272_v9 = vadd.f32 1e-05, %v270_v8 }
 0x266   :  { %v269_v10 = vpop.xlane.xlu1 %268 }
 0x267   :  { %380 = vrsqrt.f32 %v272_v9  ;;  %v271_v11 = vmul.f32 0.03125, %v269_v10 }
 0x269   :  { %v273_v12 = vadd.f32 1e-05, %v271_v11 }
 0x26b   :  { %382 = vrsqrt.f32 %v273_v12 }
 0x271   :  { %v381_v13 = vpop.eup %380 }
 0x272   :  { %v276_v15 = vmul.f32 %v381_v13, %v260_v45 }
 0x274   :  { %v285_v17 = vmul.f32 %v339_v14, %v276_v15 }
 0x275   :  { %v383_v18 = vpop.eup %382 }
 0x276   :  { %v277_v19 = vmul.f32 %v383_v18, %v261_v49  ;;  %v294_v20 = vadd.f32 %v340_v16, %v285_v17 }
 0x278   :  { %v286_v21 = vmul.f32 %v339_v14, %v277_v19  ;;  %v296_v22 = vmul.f32 2.0, %v294_v20 }
 0x27a   :  { %v295_v23 = vadd.f32 %v340_v16, %v286_v21  ;;  %298 = vst.msk [vmem:[#allocation2] sm:$0xff] %vm42_vm0, %v296_v22 }
 0x27c   :  { %v297_v24 = vmul.f32 2.0, %v295_v23 }
 0x27e   :  { %299 = vst.msk [vmem:[#allocation2 + $0x8] sm:$0xff] %vm42_vm0, %v297_v24 }
 0x27f   :  { %395 = shalt.err (!%p392_p4)
}
 0x280   :  { %s396_s29 = scalar_lea.hbm %s565_s12, 256 }
 0x281   :  { %p397_p5 = scmp.ne.s32.totalorder %s565_s12, %s396_s29  ;;  %p400_p6 = scmp.lt.u32.totalorder %s396_s29, %s565_s12 }
 0x283   :  { %p402_p7 = pnand %p400_p6, %p397_p5 }
 0x285   :  { %405 = shalt.err (!%p402_p7)
}
 0x286   :  { %s411_s8 = smov 128   ;;  %s412_s15 = smov 8  }
 0x287   :  { %315 = dma.vmem_to_hbm [thread:$0]  %s310_s27, 256, %s565_s12, [#allocation3], %s411_s8, %s411_s8, %s412_s15  }
 0x288   :  { %406 = dma.done.wait [#allocation3], 256  }
 0x289   :  { %407 = vsyncadd [#allocation3], 4294967040 }
 0x28a   :  { %323 = vsyncpa [#allocation3], 1 }

// kernel: class_attention_block_forward.9
= control target key start
LH: loop header
LB: loop body
LE: loop exit
PB: predicated region body
PF: predicated region fallthrough
CT: control target
= control target key end

     0   :  { %v199_v0 = vmov 0.0   ;;  %vm200_vm0 = vmmov 0   ;;  %vm144_vm1 = vcmask 254976   ;;  %s270_s1 = inlined_call_operand.vmem [shape: bf16[128,32], index: 1, kind: input, shape index: {}]   ;;  %s271_s0 = inlined_call_operand.vmem [shape: f32[2,128], index: 0, kind: input, shape index: {}]   ;;  %s272_s2 = inlined_call_operand.vmem [shape: f32[1,32], index: 2, kind: input, shape index: {}]   ;;  %s273_s3 = inlined_call_operand.vmem [shape: f32[1,32], index: 3, kind: input, shape index: {}]   ;;  %s274_s4 = inlined_call_operand.vmem [shape: f32[2,32], index: 4, kind: input, shape index: {}]   ;;  %s275_s5 = inlined_call_operand.vmem [shape: f32[2,32], index: 5, kind: output, shape index: {}]  }
   0x1   :  { %169 = vmatprep.subr.bf16.mxu0 %v199_v0  ;;  %v191_v1 = vld [vmem:[%s270_s1] sm:$0xff]   ;;  %185 = vmatprep.mubr.msk.bf16.mxu0 %vm200_vm0, %v199_v0  ;;  %v192_v2 = vld [vmem:[%s270_s1 + $0x8] sm:$0xff]   ;;  %v193_v3 = vld [vmem:[%s270_s1 + $0x10] sm:$0xff]  }
   0x2   :  { %170 = vmatpush3.bf16.msra.mxu0 %v191_v1  ;;  %v194_v4 = vld [vmem:[%s270_s1 + $0x18] sm:$0xff]   ;;  %v195_v5 = vld [vmem:[%s270_s1 + $0x20] sm:$0xff]   ;;  %v196_v6 = vld [vmem:[%s270_s1 + $0x28] sm:$0xff]  }
   0x3   :  { %171 = vmatprep.subr.bf16.mxu0 %v199_v0  ;;  %v197_v7 = vld [vmem:[%s270_s1 + $0x30] sm:$0xff]   ;;  %v198_v8 = vld [vmem:[%s270_s1 + $0x38] sm:$0xff]   ;;  %v21_v9 = vld [vmem:[%s271_s0] sm:$0x3] }
   0x4   :  { %v22_v10 = vpack.c.bf16 %v21_v9, %v21_v9  ;;  %v150_v11 = vld [vmem:[%s272_s2] ss:$0 sm:$0xff] }
   0x5   :  { %v159_v13 = vld [vmem:[%s273_s3] ss:$0 sm:$0xff] }
   0x6   :  { %172 = vmatpush3.bf16.msra.mxu0 %v192_v2  ;;  %v134_v16 = vld [vmem:[%s274_s4] sm:$0x3] }
   0x7   :  { %173 = vmatprep.subr.bf16.mxu0 %v199_v0 }
   0xa   :  { %174 = vmatpush3.bf16.msra.mxu0 %v193_v3 }
   0xb   :  { %175 = vmatprep.subr.bf16.mxu0 %v199_v0 }
   0xe   :  { %176 = vmatpush3.bf16.msra.mxu0 %v194_v4 }
   0xf   :  { %177 = vmatprep.subr.bf16.mxu0 %v199_v0 }
  0x12   :  { %178 = vmatpush3.bf16.msra.mxu0 %v195_v5 }
  0x13   :  { %179 = vmatprep.subr.bf16.mxu0 %v199_v0 }
  0x16   :  { %180 = vmatpush3.bf16.msra.mxu0 %v196_v6 }
  0x17   :  { %181 = vmatprep.subr.bf16.mxu0 %v199_v0 }
  0x1a   :  { %182 = vmatpush3.bf16.msra.mxu0 %v197_v7 }
  0x1b   :  { %183 = vmatprep.subr.bf16.mxu0 %v199_v0 }
  0x1e   :  { %184 = vmatpush3.bf16.msra.mxu0 %v198_v8 }
  0x21   :  { %186 = vmatmul.mubr.bf16.vlgmr.msra.gmra.mrb[0].mxu0 %v22_v10 }
  0xf4   :  { %v128_v12 = vpop.f32.mrb[0].mxu0 }
  0xf5   :  { %v129_v14 = vadd.f32 %v150_v11, %v128_v12  ;;  %v187_v15 = vpop.f32.mrb[1].mxu0 }
  0xf6   :  { %v131_v17 = vpop.f32.mrb[2].mxu0 }
  0xf7   :  { %v142_v18 = vmul.f32 %v159_v13, %v129_v14  ;;  %v188_v19 = vpop.f32.mrb[3].mxu0 }
  0xf9   :  { %v143_v20 = vadd.f32 %v142_v18, %v134_v16 }
  0xfb   :  { %145 = vst.msk [vmem:[%s275_s5] sm:$0x3] %vm144_vm1, %v143_v20 }

</bundles_post_ra>
